<compile_context>
chip_gen: v5e
topology: v5e:2x2
jax: 0.10.0
libtpu: 0.0.40
codegen_flags: <defaults>
</compile_context>

<pallas_src>
import functools

import numpy as np
import jax
import jax.numpy as jnp
from jax.experimental import pallas as pl
from jax.experimental.pallas import tpu as pltpu

EPS = 1e-5
VMEM_LIMIT = 40 * 1024 * 1024        # safe on v5e/v6e (128 MiB) and v7x (64 MiB)
RESIDENT_W_BYTES = 8 * 1024 * 1024   # weights below this stay fully VMEM-resident


def _round_up(x, m):
    return (x + m - 1) // m * m


# --------------------------- matmul kernels (1x1 convs & im2col fallbacks) ----

def _mm_resident_kernel(a_ref, w_ref, bias_ref, o_ref, *, relu):
    r = jnp.dot(a_ref[...], w_ref[...], preferred_element_type=jnp.float32)
    r = r + bias_ref[...]
    if relu:
        r = jnp.maximum(r, 0.0)
    o_ref[...] = r.astype(o_ref.dtype)


def _mm_resident_res_kernel(a_ref, w_ref, bias_ref, res_ref, o_ref):
    # Fused bottleneck epilogue: relu(conv + bias + identity).
    r = jnp.dot(a_ref[...], w_ref[...], preferred_element_type=jnp.float32)
    r = r + bias_ref[...] + res_ref[...].astype(jnp.float32)
    o_ref[...] = jnp.maximum(r, 0.0).astype(o_ref.dtype)


def _mm_tiled_kernel(a_ref, b_ref, bias_ref, o_ref, acc_ref, *, relu):
    @pl.when(pl.program_id(2) == 0)
    def _():
        acc_ref[...] = jnp.zeros_like(acc_ref)

    acc_ref[...] += jnp.dot(a_ref[...], b_ref[...],
                            preferred_element_type=jnp.float32)

    @pl.when(pl.program_id(2) == pl.num_programs(2) - 1)
    def _():
        r = acc_ref[...] + bias_ref[...]
        if relu:
            r = jnp.maximum(r, 0.0)
        o_ref[...] = r.astype(o_ref.dtype)


def _mm_tiled_res_kernel(a_ref, b_ref, bias_ref, res_ref, o_ref, acc_ref):
    @pl.when(pl.program_id(2) == 0)
    def _():
        acc_ref[...] = jnp.zeros_like(acc_ref)

    acc_ref[...] += jnp.dot(a_ref[...], b_ref[...],
                            preferred_element_type=jnp.float32)

    @pl.when(pl.program_id(2) == pl.num_programs(2) - 1)
    def _():
        r = acc_ref[...] + bias_ref[...] + res_ref[...].astype(jnp.float32)
        o_ref[...] = jnp.maximum(r, 0.0).astype(o_ref.dtype)


def matmul_bias_act(a, w, bias, cout, relu=False, residual=None,
                    out_dtype=jnp.bfloat16):
    """a: [M, K] activations; w: [Kp, Np] pre-padded bf16 weight; bias [1, Np]
    f32; optional residual [M, cout].  Returns [M, cout]."""
    M, K = a.shape
    Kp, Np = w.shape
    if a.dtype != jnp.bfloat16:
        a = a.astype(jnp.bfloat16)
    tm = min(512, _round_up(M, 16))          # multiple of 16 for bf16 sublanes
    Mp = _round_up(M, tm)
    if Mp != M or Kp != K:
        a = jnp.pad(a, ((0, Mp - M), (0, Kp - K)))

    res = None
    if residual is not None:
        res = residual
        if res.dtype != jnp.bfloat16:
            res = res.astype(jnp.bfloat16)
        rM, rN = res.shape
        if rM != Mp or rN != Np:
            res = jnp.pad(res, ((0, Mp - rM), (0, Np - rN)))

    if Kp * Np * 2 <= RESIDENT_W_BYTES:
        # Whole weight resident in VMEM (constant block index -> DMA'd once);
        # the full K reduction is one jnp.dot per M tile.
        args = [a, w, bias]
        in_specs = [pl.BlockSpec((tm, Kp), lambda i: (i, 0)),
                    pl.BlockSpec((Kp, Np), lambda i: (0, 0)),
                    pl.BlockSpec((1, Np), lambda i: (0, 0))]
        if res is not None:
            args.append(res)
            in_specs.append(pl.BlockSpec((tm, Np), lambda i: (i, 0)))
            kernel = _mm_resident_res_kernel
        else:
            kernel = functools.partial(_mm_resident_kernel, relu=relu)
        out = pl.pallas_call(
            kernel,
            out_shape=jax.ShapeDtypeStruct((Mp, Np), out_dtype),
            grid_spec=pltpu.PrefetchScalarGridSpec(
                num_scalar_prefetch=0,
                grid=(Mp // tm,),
                in_specs=in_specs,
                out_specs=pl.BlockSpec((tm, Np), lambda i: (i, 0))),
            compiler_params=pltpu.CompilerParams(
                dimension_semantics=("parallel",),
                vmem_limit_bytes=VMEM_LIMIT),
        )(*args)
    else:
        # Fallback: tiled K-loop matmul with f32 VMEM accumulator.
        tn = 512 if Np % 512 == 0 else (256 if Np % 256 == 0 else 128)
        tk = 128
        for cand in (2048, 1536, 1024, 768, 512, 384, 256):
            if Kp % cand == 0:
                tk = cand
                break
        args = [a, w, bias]
        in_specs = [pl.BlockSpec((tm, tk), lambda i, j, k: (i, k)),
                    pl.BlockSpec((tk, tn), lambda i, j, k: (k, j)),
                    pl.BlockSpec((1, tn), lambda i, j, k: (0, j))]
        if res is not None:
            args.append(res)
            in_specs.append(pl.BlockSpec((tm, tn), lambda i, j, k: (i, j)))
            kernel = _mm_tiled_res_kernel
        else:
            kernel = functools.partial(_mm_tiled_kernel, relu=relu)
        out = pl.pallas_call(
            kernel,
            out_shape=jax.ShapeDtypeStruct((Mp, Np), out_dtype),
            grid_spec=pltpu.PrefetchScalarGridSpec(
                num_scalar_prefetch=0,
                grid=(Mp // tm, Np // tn, Kp // tk),
                in_specs=in_specs,
                out_specs=pl.BlockSpec((tm, tn), lambda i, j, k: (i, j)),
                scratch_shapes=[pltpu.VMEM((tm, tn), jnp.float32)]),
            compiler_params=pltpu.CompilerParams(
                dimension_semantics=("parallel", "parallel", "arbitrary"),
                vmem_limit_bytes=VMEM_LIMIT),
        )(*args)

    if Mp != M or Np != cout:
        out = out[:M, :cout]
    return out


# --------------------------- direct 3x3 (stride 1) convolution ----------------

def _conv3x3_kernel(x0_ref, x1_ref, x2_ref, w_ref, b_ref, *rest,
                    cin, wout, dil, cout, relu, has_res):
    if has_res:
        res_ref, o_ref = rest
    else:
        (o_ref,) = rest
    acc = None
    for i, x_ref in enumerate((x0_ref, x1_ref, x2_ref)):
        row = x_ref[0, 0]                              # (wout + 2*dil, cin) bf16
        for j in range(3):
            xi = row[j * dil:j * dil + wout, :]        # static in-VMEM slice
            wk = w_ref[(i * 3 + j) * cin:(i * 3 + j + 1) * cin, :]
            part = jnp.dot(xi, wk, preferred_element_type=jnp.float32)
            acc = part if acc is None else acc + part
    acc = acc + b_ref[...]
    if has_res:
        acc = acc + res_ref[0, 0].astype(jnp.float32)
    if relu:
        acc = jnp.maximum(acc, 0.0)
    o_ref[0, 0] = acc[:, :cout].astype(o_ref.dtype)


def conv3x3_direct(x, p, dil, relu=False, residual=None, out_dtype=jnp.bfloat16):
    """3x3 / stride-1 / padding==dilation conv: padded rows gathered via
    BlockSpec index maps, resident weight, 9 MXU taps -- no im2col in HBM."""
    N, H, W, C = x.shape
    cout = p["cout"]
    Kp, Np = p["w"].shape
    if x.dtype != jnp.bfloat16:
        x = x.astype(jnp.bfloat16)
    xp = jnp.pad(x, ((0, 0), (dil, dil), (dil, dil), (0, 0)))
    Wp = W + 2 * dil
    args = [xp, xp, xp, p["w"], p["b"]]
    in_specs = [pl.BlockSpec((1, 1, Wp, C),
                             (lambda n, h, i=i: (n, h + i * dil, 0, 0)))
                for i in range(3)]
    in_specs += [pl.BlockSpec((Kp, Np), lambda n, h: (0, 0)),
                 pl.BlockSpec((1, Np), lambda n, h: (0, 0))]
    has_res = residual is not None
    if has_res:
        args.append(residual)
        in_specs.append(pl.BlockSpec((1, 1, W, cout), lambda n, h: (n, h, 0, 0)))
    kernel = functools.partial(_conv3x3_kernel, cin=C, wout=W, dil=dil,
                               cout=cout, relu=relu, has_res=has_res)
    return pl.pallas_call(
        kernel,
        out_shape=jax.ShapeDtypeStruct((N, H, W, cout), out_dtype),
        grid_spec=pltpu.PrefetchScalarGridSpec(
            num_scalar_prefetch=0,
            grid=(N, H),
            in_specs=in_specs,
            out_specs=pl.BlockSpec((1, 1, W, cout), lambda n, h: (n, h, 0, 0))),
        compiler_params=pltpu.CompilerParams(
            dimension_semantics=("parallel", "parallel"),
            vmem_limit_bytes=VMEM_LIMIT),
    )(*args)


# --------------------------- convolution glue ---------------------------------

def conv2d_nhwc(x, p, kh, kw, stride=1, padding=0, dilation=1, relu=False,
                residual=None, out_dtype=jnp.bfloat16):
    N, H, W, C = x.shape
    cout = p["cout"]
    if x.dtype != jnp.bfloat16:
        x = x.astype(jnp.bfloat16)
    Hout = (H + 2 * padding - dilation * (kh - 1) - 1) // stride + 1
    Wout = (W + 2 * padding - dilation * (kw - 1) - 1) // stride + 1

    if kh == 1 and kw == 1 and padding == 0:
        xs = x if stride == 1 else x[:, ::stride, ::stride, :]
        col = xs.reshape(N * Hout * Wout, C)
        res = None if residual is None else residual.reshape(N * Hout * Wout, cout)
        out = matmul_bias_act(col, p["w"], p["b"], cout, relu=relu, residual=res,
                              out_dtype=out_dtype)
        return out.reshape(N, Hout, Wout, cout)

    if kh == 3 and kw == 3 and stride == 1 and padding == dilation:
        return conv3x3_direct(x, p, dilation, relu=relu, residual=residual,
                              out_dtype=out_dtype)

    # Fallback im2col (only conv1 7x7/s2 and the single 3x3/s2 in layer2.0).
    # TODO(synk): strided k>1 convs still materialize a channels-last im2col.
    xq = x if padding == 0 else jnp.pad(
        x, ((0, 0), (padding, padding), (padding, padding), (0, 0)))
    taps = []
    for i in range(kh):
        for j in range(kw):
            taps.append(
                xq[:,
                   i * dilation:i * dilation + stride * (Hout - 1) + 1:stride,
                   j * dilation:j * dilation + stride * (Wout - 1) + 1:stride,
                   :])
    col = jnp.concatenate(taps, axis=-1).reshape(N * Hout * Wout, C * kh * kw)
    assert col.shape[1] == p["k"]
    res = None if residual is None else residual.reshape(N * Hout * Wout, cout)
    out = matmul_bias_act(col, p["w"], p["b"], cout, relu=relu, residual=res,
                          out_dtype=out_dtype)
    return out.reshape(N, Hout, Wout, cout)


# --------------------------- maxpool kernel -----------------------------------

def _maxpool_kernel(r0_ref, r1_ref, r2_ref, o_ref):
    o_ref[0, 0] = jnp.maximum(jnp.maximum(r0_ref[0, 0], r1_ref[0, 0]),
                              r2_ref[0, 0])


def maxpool_3x3_s2_p1_nhwc(x):
    """nn.MaxPool2d(3, stride=2, padding=1) on an NHWC tensor."""
    N, H, W, C = x.shape
    Hout = (H + 2 - 3) // 2 + 1
    Wout = (W + 2 - 3) // 2 + 1
    xp = jnp.pad(x, ((0, 0), (1, 1), (1, 1), (0, 0)), constant_values=-jnp.inf)
    # Column-tap max folded into one fused XLA elementwise pass; the Pallas
    # kernel only gathers the 3 row taps (3 input streams instead of 9).
    c0 = xp[:, :, 0:2 * (Wout - 1) + 1:2, :]
    c1 = xp[:, :, 1:1 + 2 * (Wout - 1) + 1:2, :]
    c2 = xp[:, :, 2:2 + 2 * (Wout - 1) + 1:2, :]
    cm = jnp.maximum(jnp.maximum(c0, c1), c2)          # (N, H+2, Wout, C)
    in_specs = [pl.BlockSpec((1, 1, Wout, C),
                             (lambda n, ho, r=r: (n, 2 * ho + r, 0, 0)))
                for r in range(3)]
    return pl.pallas_call(
        _maxpool_kernel,
        out_shape=jax.ShapeDtypeStruct((N, Hout, Wout, C), x.dtype),
        grid_spec=pltpu.PrefetchScalarGridSpec(
            num_scalar_prefetch=0,
            grid=(N, Hout),
            in_specs=in_specs,
            out_specs=pl.BlockSpec((1, 1, Wout, C), lambda n, ho: (n, ho, 0, 0))),
        compiler_params=pltpu.CompilerParams(
            dimension_semantics=("parallel", "arbitrary")),
    )(cm, cm, cm)


# --------------------------- bilinear upsample --------------------------------

def _bilinear_coeffs(in_size, out_size):
    # torch F.interpolate(mode='bilinear', align_corners=False) semantics.
    scale = in_size / out_size
    i0 = np.zeros((out_size,), np.int32)
    i1 = np.zeros((out_size,), np.int32)
    lam = np.zeros((out_size,), np.float32)
    for o in range(out_size):
        src = max((o + 0.5) * scale - 0.5, 0.0)
        a = min(int(np.floor(src)), in_size - 1)
        b = min(a + 1, in_size - 1)
        i0[o], i1[o] = a, b
        lam[o] = min(max(src - a, 0.0), 1.0)
    return i0, i1, lam


def _upsample_kernel(i0_ref, i1_ref, ly_ref, r0_ref, r1_ref, wmat_ref, o_ref):
    del i0_ref, i1_ref                         # consumed by the index maps
    wy = ly_ref[0]                             # (1, 1) f32 vertical weight
    r0 = r0_ref[0, 0].astype(jnp.float32)      # (W_in, C)
    r1 = r1_ref[0, 0].astype(jnp.float32)
    row = r0 + wy * (r1 - r0)                  # vertical lerp on the VPU
    out = jnp.dot(wmat_ref[...], row,          # horizontal interp on the MXU
                  preferred_element_type=jnp.float32)
    o_ref[0, 0] = out.astype(o_ref.dtype)


def bilinear_upsample_nhwc(x, out_h, out_w, out_dtype=jnp.bfloat16):
    """Bilinear upsample (align_corners=False), NHWC.  Rows are gathered via
    scalar-prefetch index maps; a single resident (out_w, W_in) column-weight
    matrix does the horizontal interpolation on the MXU."""
    N, H, W, C = x.shape
    i0, i1, wy = _bilinear_coeffs(H, out_h)
    j0, j1, wx = _bilinear_coeffs(W, out_w)
    wmat = np.zeros((out_w, W), np.float32)
    np.add.at(wmat, (np.arange(out_w), j0), 1.0 - wx)
    np.add.at(wmat, (np.arange(out_w), j1), wx)
    wmat = jnp.asarray(wmat)
    ly = jnp.asarray(wy.reshape(out_h, 1, 1))
    i0 = jnp.asarray(i0)
    i1 = jnp.asarray(i1)
    return pl.pallas_call(
        _upsample_kernel,
        out_shape=jax.ShapeDtypeStruct((N, out_h, out_w, C), out_dtype),
        grid_spec=pltpu.PrefetchScalarGridSpec(
            num_scalar_prefetch=2,
            grid=(N, out_h),
            in_specs=[
                pl.BlockSpec((1, 1, 1),
                             lambda n, ho, i0r, i1r: (ho, 0, 0)),
                pl.BlockSpec((1, 1, W, C),
                             lambda n, ho, i0r, i1r: (n, i0r[ho], 0, 0)),
                pl.BlockSpec((1, 1, W, C),
                             lambda n, ho, i0r, i1r: (n, i1r[ho], 0, 0)),
                pl.BlockSpec((out_w, W),
                             lambda n, ho, i0r, i1r: (0, 0)),
            ],
            out_specs=pl.BlockSpec((1, 1, out_w, C),
                                   lambda n, ho, i0r, i1r: (n, ho, 0, 0))),
        compiler_params=pltpu.CompilerParams(
            dimension_semantics=("parallel", "arbitrary")),
    )(i0, i1, ly, x, x, wmat)


# --------------------------- parameters ---------------------------------------

class _KeyGen:
    def __init__(self, seed):
        self._key = jax.random.PRNGKey(seed)

    def __call__(self):
        self._key, k = jax.random.split(self._key)
        return k


def _pack_conv(w, b):
    """OIHW weights -> im2col-matching, pre-padded bf16 [Kp, Np] operand plus an
    f32 [1, Np] bias row (done once at build time)."""
    cout, cin, kh, kw = w.shape
    K = cin * kh * kw
    Kp = _round_up(K, 128)
    Np = _round_up(cout, 128)
    wmat = jnp.transpose(w, (2, 3, 1, 0)).reshape(K, cout)
    wmat = jnp.pad(wmat, ((0, Kp - K), (0, Np - cout))).astype(jnp.bfloat16)
    bias = jnp.pad(b.reshape(1, cout).astype(jnp.float32),
                   ((0, 0), (0, Np - cout)))
    return {"w": wmat, "b": bias, "cout": int(cout), "k": int(K)}


def _conv_bn_tensors(kg, cin, cout, k):
    fan_in = cin * k * k
    w = jax.random.normal(kg(), (cout, cin, k, k), jnp.float32) / np.sqrt(fan_in)
    gamma = 1.0 + 0.1 * jax.random.normal(kg(), (cout,), jnp.float32)
    beta = 0.1 * jax.random.normal(kg(), (cout,), jnp.float32)
    mean = 0.1 * jax.random.normal(kg(), (cout,), jnp.float32)
    var = 0.5 + jax.random.uniform(kg(), (cout,), jnp.float32)
    scale = gamma / jnp.sqrt(var + EPS)          # eval-mode BN folded into conv
    return w * scale[:, None, None, None], beta - mean * scale


def _conv_bn_params(kg, cin, cout, k):
    w, b = _conv_bn_tensors(kg, cin, cout, k)
    return _pack_conv(w, b)


def _conv_params(kg, cin, cout, k, bias=True):
    fan_in = cin * k * k
    w = jax.random.normal(kg(), (cout, cin, k, k), jnp.float32) / np.sqrt(fan_in)
    b = (0.01 * jax.random.normal(kg(), (cout,), jnp.float32)
         if bias else jnp.zeros((cout,), jnp.float32))
    return _pack_conv(w, b)


# (planes, num_blocks, first_stride, first_dilation, rest_dilation); layer3/4
# use replace_stride_with_dilation=[False, True, True] (torchvision fcn_resnet50).
_LAYER_CFGS = (
    (64, 3, 1, 1, 1),
    (128, 4, 2, 1, 1),
    (256, 6, 1, 1, 2),
    (512, 3, 1, 2, 4),
)


def build_params(in_channels, seed=0):
    # TODO(synk): pretrained 'DEFAULT' weights cannot be loaded here; parameters
    # are deterministic synthetic values with the correct shapes.
    kg = _KeyGen(seed)
    params = {"conv1": _conv_bn_params(kg, in_channels, 64, 7)}
    layers = []
    inplanes = 64
    for planes, blocks, first_stride, _, _ in _LAYER_CFGS:
        layer = []
        for bidx in range(blocks):
            cin = inplanes if bidx == 0 else planes * 4
            blk = {
                "c1": _conv_bn_params(kg, cin, planes, 1),
                "c2": _conv_bn_params(kg, planes, planes, 3),
                "c3": _conv_bn_params(kg, planes, planes * 4, 1),
            }
            if bidx == 0 and (first_stride != 1 or inplanes != planes * 4):
                blk["ds"] = _conv_bn_params(kg, inplanes, planes * 4, 1)
            layer.append(blk)
        inplanes = planes * 4
        layers.append(layer)
    params["layers"] = layers
    # FCN head conv3x3(2048->512, no bias)+BN, split along input channels so
    # each resident weight is <= ~9.5 MB bf16 (fits v7x VMEM even double-buffered).
    wh, bh = _conv_bn_tensors(kg, 2048, 512, 3)
    params["head"] = (_pack_conv(wh[:, :1024], jnp.zeros_like(bh)),
                      _pack_conv(wh[:, 1024:], bh))
    params["final"] = _conv_params(kg, 512, 1, 3, bias=True)
    return params


# --------------------------- forward -------------------------------------------

def _bottleneck(x, blk, stride, dilation):
    out = conv2d_nhwc(x, blk["c1"], 1, 1, relu=True)
    out = conv2d_nhwc(out, blk["c2"], 3, 3, stride=stride,
                      padding=dilation, dilation=dilation, relu=True)
    if "ds" in blk:
        identity = conv2d_nhwc(x, blk["ds"], 1, 1, stride=stride)
    else:
        identity = x
    # residual add + ReLU fused into the c3 matmul epilogue
    return conv2d_nhwc(out, blk["c3"], 1, 1, residual=identity)


def fcn_resnet50_forward(params, x, out2=None):
    # Module boundary is NCHW (PyTorch); internal layout is NHWC/bf16.
    xn = jnp.transpose(x, (0, 2, 3, 1))
    h = conv2d_nhwc(xn, params["conv1"], 7, 7, stride=2, padding=3, relu=True)
    h = maxpool_3x3_s2_p1_nhwc(h)
    for li, (planes, blocks, first_stride, first_dil, rest_dil) in enumerate(_LAYER_CFGS):
        for bi in range(blocks):
            stride = first_stride if bi == 0 else 1
            dil = first_dil if bi == 0 else rest_dil
            h = _bottleneck(h, params["layers"][li][bi], stride, dil)
    # FCN head: Conv3x3(2048->512, no bias)+BN+ReLU split into two 1024-channel
    # halves (second half fuses the first half's partial sum, bias and ReLU).
    # Dropout(0.1) and classifier[4] are eval-mode identity.
    part = conv2d_nhwc(h[..., :1024], params["head"][0], 3, 3, padding=1,
                       relu=False, out_dtype=jnp.float32)
    h = conv2d_nhwc(h[..., 1024:], params["head"][1], 3, 3, padding=1,
                    relu=True, residual=part)
    # model(x)['out'] = bilinear upsample to the input spatial size (bf16 feed
    # for the final conv; the returned `pre` is cast back to f32).
    pre = bilinear_upsample_nhwc(h, x.shape[2], x.shape[3])
    if out2 is None:
        xx = pre
    else:
        xx = pre.astype(jnp.float32) + jnp.transpose(out2, (0, 2, 3, 1))
    out = conv2d_nhwc(xx, params["final"], 3, 3, padding=1,
                      out_dtype=jnp.float32)
    return (jnp.transpose(out, (0, 3, 1, 2)),
            jnp.transpose(pre.astype(jnp.float32), (0, 3, 1, 2)))


if __name__ == "__main__":
    in_channels = 3
    params = build_params(in_channels, seed=0)
    x = jax.random.normal(jax.random.PRNGKey(0), (2, in_channels, 32, 32),
                          jnp.float32)
    out, pre = fcn_resnet50_forward(params, x)
    out, pre = jax.block_until_ready((out, pre))
    assert out.shape == (2, 1, 32, 32), out.shape
    assert pre.shape == (2, 512, 32, 32), pre.shape
    assert bool(jnp.all(jnp.isfinite(out))) and bool(jnp.all(jnp.isfinite(pre)))
    print("KERNEL_OK")
</pallas_src>

<mosaic_0001>
module attributes {stable_mosaic.version = 11 : i64} {
  func.func @_mm_resident_kernel(%arg0: i32, %arg1: memref<512x256xbf16, #tpu.memory_space<vmem>>, %arg2: memref<256x128xbf16, #tpu.memory_space<vmem>>, %arg3: memref<1x128xf32, #tpu.memory_space<vmem>>, %arg4: memref<512x128xbf16, #tpu.memory_space<vmem>>) attributes {dimension_semantics = [#tpu.dimension_semantics<parallel>], iteration_bounds = array<i64: 1>, scalar_prefetch = 0 : i64, scratch_operands = 0 : i64, tpu.core_type = #tpu.core_type<tc>, window_params = [{transform_indices = @transform_0, window_bounds = array<i64: 512, 256>}, {pipeline_mode = #tpu.pipeline_mode<synchronous>, transform_indices = @transform_1, window_bounds = array<i64: 256, 128>}, {pipeline_mode = #tpu.pipeline_mode<synchronous>, transform_indices = @transform_2, window_bounds = array<i64: 1, 128>}, {transform_indices = @transform_3, window_bounds = array<i64: 512, 128>}]} {
    %c0 = arith.constant 0 : index
    %c0_0 = arith.constant 0 : index
    %0 = vector.load %arg1[%c0, %c0_0] : memref<512x256xbf16, #tpu.memory_space<vmem>>, vector<512x256xbf16>
    %c0_1 = arith.constant 0 : index
    %c0_2 = arith.constant 0 : index
    %1 = vector.load %arg2[%c0_1, %c0_2] : memref<256x128xbf16, #tpu.memory_space<vmem>>, vector<256x128xbf16>
    %cst = arith.constant dense<0.000000e+00> : vector<512x128xf32>
    %2 = tpu.matmul %0, %1, %cst {dimension_numbers = #tpu.dot_dimension_numbers<[1], [0], [0], [1], [0, 0, 1, 1], [], []>} : vector<512x256xbf16>, vector<256x128xbf16>, vector<512x128xf32> -> vector<512x128xf32>
    %c0_3 = arith.constant 0 : index
    %c0_4 = arith.constant 0 : index
    %3 = vector.load %arg3[%c0_3, %c0_4] : memref<1x128xf32, #tpu.memory_space<vmem>>, vector<1x128xf32>
    %4 = vector.broadcast %3 : vector<1x128xf32> to vector<512x128xf32>
    %5 = arith.addf %2, %4 : vector<512x128xf32>
    %cst_5 = arith.constant 0.000000e+00 : f32
    %6 = vector.broadcast %cst_5 : f32 to vector<512x128xf32>
    %7 = arith.maximumf %5, %6 : vector<512x128xf32>
    %8 = arith.truncf %7 : vector<512x128xf32> to vector<512x128xbf16>
    %c0_6 = arith.constant 0 : index
    %c0_7 = arith.constant 0 : index
    %9 = vector.load %arg4[%c0_6, %c0_7] : memref<512x128xbf16, #tpu.memory_space<vmem>>, vector<512x128xbf16>
    tpu.vector_store %arg4[%c0_6, %c0_7], %8 {strides = array<i32>} : memref<512x128xbf16, #tpu.memory_space<vmem>>, vector<512x128xbf16>,
    return
  }
  func.func @transform_0(%arg0: i32) -> (i32, i32) {
    %c0_i32 = arith.constant 0 : i32
    %c0_i32_0 = arith.constant 0 : i32
    return %arg0, %c0_i32 : i32, i32
  }
  func.func @transform_1(%arg0: i32) -> (i32, i32) {
    %c0_i32 = arith.constant 0 : i32
    %c0_i32_0 = arith.constant 0 : i32
    %c0_i32_1 = arith.constant 0 : i32
    return %c0_i32, %c0_i32_0 : i32, i32
  }
  func.func @transform_2(%arg0: i32) -> (i32, i32) {
    %c0_i32 = arith.constant 0 : i32
    %c0_i32_0 = arith.constant 0 : i32
    %c0_i32_1 = arith.constant 0 : i32
    return %c0_i32, %c0_i32_0 : i32, i32
  }
  func.func @transform_3(%arg0: i32) -> (i32, i32) {
    %c0_i32 = arith.constant 0 : i32
    %c0_i32_0 = arith.constant 0 : i32
    return %arg0, %c0_i32 : i32, i32
  }
}

</mosaic_0001>

<bundles_post_ra>
// kernel: tpu_custom_call.1
= control target key start
LH: loop header
LB: loop body
LE: loop exit
PB: predicated region body
PF: predicated region fallthrough
CT: control target
= control target key end

     0   :  { %8 = vsyncpa [#allocation3], 0  ;;  %s1917_s0 = inlined_call_operand.hbm [shape: bf16[512,256], index: 0, kind: input, shape index: {}]   ;;  %s1918_s1 = inlined_call_operand.hbm [shape: bf16[256,128], index: 1, kind: input, shape index: {}]   ;;  %s1919_s2 = inlined_call_operand.vmem [shape: f32[1,128], index: 2, kind: input, shape index: {}]   ;;  %s1920_s3 = inlined_call_operand.hbm [shape: bf16[512,128], index: 3, kind: output, shape index: {}]  }
   0x1   :  { %9 = vsyncpa [#allocation6], 0 }
   0x2   :  { %10 = vsyncpa [#allocation4], 0  ;;  %s15_s14 = sshll.u32 %s1917_s0, 4  ;;  %s1806_s15 = smov [#allocation2]   ;;  %s16_s14 = int_to_ptr.hbm [resolvable:$true] %s15_s14 }
   0x3   :  { %s17_s16 = sshll.u32 %s1806_s15, 4  ;;  %s28_s19 = sshll.u32 %s1918_s1, 4  ;;  %s18_s16 = int_to_ptr.vmem [resolvable:$true] %s17_s16  ;;  %s29_s19 = int_to_ptr.hbm [resolvable:$true] %s28_s19 }
   0x4   :  { %s1807_s20 = smov 128   ;;  %s1808_s21 = smov 8  }
   0x5   :  { %23 = dma.hbm_to_vmem [thread:$0]  %s16_s14, 8192, %s18_s16, [#allocation3], %s1807_s20, %s1807_s20, %s1808_s21  }
   0x6   :  { %s1809_s22 = smov [#allocation5]   ;;  %s1810_s24 = smov 64  }
   0x7   :  { %s30_s23 = sshll.u32 %s1809_s22, 4  ;;  %s1811_s25 = smov 4   ;;  %s31_s23 = int_to_ptr.vmem [resolvable:$true] %s30_s23 }
   0x8   :  { %36 = dma.hbm_to_vmem [thread:$0]  %s29_s19, 2048, %s31_s23, [#allocation6], %s1810_s24, %s1810_s24, %s1811_s25  }
   0x9   :  { %1800 = dma.done.wait [#allocation3], 8192  }
   0xa   :  { %1801 = vsyncadd [#allocation3], 4294959104 }
   0xb   :  { %1802 = dma.done.wait [#allocation6], 2048  }
   0xc   :  { %1803 = vsyncadd [#allocation6], 4294965248  ;;  %v1504_v0 = vld [vmem:[#allocation5 + $0x38] sm:$0xff]  ;;  %v1503_v2 = vld [vmem:[#allocation5 + $0x30] sm:$0xff]  ;;  %s1099_s29 = sshll.u32 %s1920_s3, 4  ;;  %s1100_s29 = int_to_ptr.hbm [resolvable:$true] %s1099_s29 }
   0xd   :  { %v1512_v1 = vld [vmem:[#allocation5 + $0x78] sm:$0xff]  ;;  %563 = vmatpush.bf16.msra.mxu0 %v1504_v0  ;;  %1704 = vmatpush.bf16.msra.mxu2 %v1504_v0  ;;  %v1511_v3 = vld [vmem:[#allocation5 + $0x70] sm:$0xff]  ;;  %v1502_v4 = vld [vmem:[#allocation5 + $0x28] sm:$0xff] }
   0xe   :  { %732 = vmatpush.bf16.msra.mxu1 %v1512_v1  ;;  %1712 = vmatpush.bf16.msra.mxu3 %v1512_v1  ;;  %v1510_v5 = vld [vmem:[#allocation5 + $0x68] sm:$0xff]  ;;  %v1501_v6 = vld [vmem:[#allocation5 + $0x20] sm:$0xff]  ;;  %v1500_v8 = vld [vmem:[#allocation5 + $0x18] sm:$0xff] }
   0xf   :  { %v1509_v7 = vld [vmem:[#allocation5 + $0x60] sm:$0xff]  ;;  %v1508_v9 = vld [vmem:[#allocation5 + $0x58] sm:$0xff]  ;;  %v1499_v10 = vld [vmem:[#allocation5 + $0x10] sm:$0xff] }
  0x10   :  { %v1507_v11 = vld [vmem:[#allocation5 + $0x50] sm:$0xff]  ;;  %v1498_v12 = vld [vmem:[#allocation5 + $0x8] sm:$0xff]  ;;  %v1497_v14 = vld [vmem:[#allocation5] sm:$0xff] }
  0x11   :  { %564 = vmatpush.bf16.msra.mxu0 %v1503_v2  ;;  %1705 = vmatpush.bf16.msra.mxu2 %v1503_v2  ;;  %v1506_v13 = vld [vmem:[#allocation5 + $0x48] sm:$0xff]  ;;  %v1505_v15 = vld [vmem:[#allocation5 + $0x40] sm:$0xff]  ;;  %v1123_v28 = vld [vmem:[#allocation2 + $0x10] sm:$0xf] }
  0x12   :  { %733 = vmatpush.bf16.msra.mxu1 %v1511_v3  ;;  %1713 = vmatpush.bf16.msra.mxu3 %v1511_v3  ;;  %v1115_v16 = vld [vmem:[#allocation2] sm:$0xf]  ;;  %v1434_v17 = vld [vmem:[#allocation2 + $0x4] sm:$0xf0]  ;;  %v1433_v20 = vld [vmem:[#allocation2 + $0x4] sm:$0xf] }
  0x13   :  { %v1243_v18 = vld [vmem:[#allocation2 + $0x100] sm:$0xf]  ;;  %v1466_v19 = vld [vmem:[#allocation2 + $0x104] sm:$0xf0]  ;;  %v1117_v21 = vld [vmem:[#allocation2 + $0x8] sm:$0xf0]  ;;  %v1116_v24 = vor.u32 %v1434_v17, %v1115_v16 }
  0x14   :  { %v1465_v22 = vld [vmem:[#allocation2 + $0x104] sm:$0xf]  ;;  %v1245_v23 = vld [vmem:[#allocation2 + $0x108] sm:$0xf0]  ;;  %v1244_v25 = vor.u32 %v1466_v19, %v1243_v18  ;;  %v1120_v26 = vor.u32 %v1433_v20, %v1117_v21  ;;  %v1436_v29 = vld [vmem:[#allocation2 + $0x14] sm:$0xf0] }
  0x15   :  { %565 = vmatpush.bf16.msra.mxu0 %v1502_v4  ;;  %1706 = vmatpush.bf16.msra.mxu2 %v1502_v4  ;;  %v1248_v27 = vor.u32 %v1465_v22, %v1245_v23  ;;  %v1251_v30 = vld [vmem:[#allocation2 + $0x110] sm:$0xf]  ;;  %v1468_v31 = vld [vmem:[#allocation2 + $0x114] sm:$0xf0]  ;;  %v1435_v32 = vld [vmem:[#allocation2 + $0x14] sm:$0xf]  ;;  %v1124_v36 = vor.u32 %v1436_v29, %v1123_v28 }
  0x16   :  { %734 = vmatpush.bf16.msra.mxu1 %v1510_v5  ;;  %1714 = vmatpush.bf16.msra.mxu3 %v1510_v5  ;;  %v1125_v33 = vld [vmem:[#allocation2 + $0x18] sm:$0xf0]  ;;  %v1467_v34 = vld [vmem:[#allocation2 + $0x114] sm:$0xf]  ;;  %v1252_v37 = vor.u32 %v1468_v31, %v1251_v30  ;;  %v1131_v40 = vld [vmem:[#allocation2 + $0x20] sm:$0xf] }
  0x17   :  { %v1253_v35 = vld [vmem:[#allocation2 + $0x118] sm:$0xf0]  ;;  %v1128_v38 = vor.u32 %v1435_v32, %v1125_v33  ;;  %v1438_v41 = vld [vmem:[#allocation2 + $0x24] sm:$0xf0]  ;;  %v1259_v42 = vld [vmem:[#allocation2 + $0x120] sm:$0xf] }
  0x18   :  { %v1256_v39 = vor.u32 %v1467_v34, %v1253_v35  ;;  %v1470_v43 = vld [vmem:[#allocation2 + $0x124] sm:$0xf0]  ;;  %v1437_v44 = vld [vmem:[#allocation2 + $0x24] sm:$0xf]  ;;  %v1133_v45 = vld [vmem:[#allocation2 + $0x28] sm:$0xf0]  ;;  %v1132_v48 = vor.u32 %v1438_v41, %v1131_v40 }
  0x19   :  { %566 = vmatpush.bf16.msra.mxu0 %v1501_v6  ;;  %1707 = vmatpush.bf16.msra.mxu2 %v1501_v6  ;;  %v1469_v46 = vld [vmem:[#allocation2 + $0x124] sm:$0xf]  ;;  %v1261_v47 = vld [vmem:[#allocation2 + $0x128] sm:$0xf0]  ;;  %v1260_v49 = vor.u32 %v1470_v43, %v1259_v42  ;;  %v1136_v50 = vor.u32 %v1437_v44, %v1133_v45  ;;  %v1139_v52 = vld [vmem:[#allocation2 + $0x30] sm:$0xf] }
  0x1a   :  { %735 = vmatpush.bf16.msra.mxu1 %v1509_v7  ;;  %1715 = vmatpush.bf16.msra.mxu3 %v1509_v7  ;;  %v1264_v51 = vor.u32 %v1469_v46, %v1261_v47  ;;  %v1440_v53 = vld [vmem:[#allocation2 + $0x34] sm:$0xf0]  ;;  %v1267_v54 = vld [vmem:[#allocation2 + $0x130] sm:$0xf]  ;;  %v1439_v56 = vld [vmem:[#allocation2 + $0x34] sm:$0xf] }
  0x1b   :  { %v1472_v55 = vld [vmem:[#allocation2 + $0x134] sm:$0xf0]  ;;  %v1141_v57 = vld [vmem:[#allocation2 + $0x38] sm:$0xf0]  ;;  %v1471_v58 = vld [vmem:[#allocation2 + $0x134] sm:$0xf]  ;;  %v1140_v60 = vor.u32 %v1440_v53, %v1139_v52 }
  0x1c   :  { %v1269_v59 = vld [vmem:[#allocation2 + $0x138] sm:$0xf0]  ;;  %v1268_v61 = vor.u32 %v1472_v55, %v1267_v54  ;;  %v1144_v62 = vor.u32 %v1439_v56, %v1141_v57  ;;  %v1147_v0 = vld [vmem:[#allocation2 + $0x40] sm:$0xf]  ;;  %v1442_v1 = vld [vmem:[#allocation2 + $0x44] sm:$0xf0] }
  0x1d   :  { %567 = vmatpush.bf16.msra.mxu0 %v1500_v8  ;;  %1708 = vmatpush.bf16.msra.mxu2 %v1500_v8  ;;  %v1272_v63 = vor.u32 %v1471_v58, %v1269_v59  ;;  %v1275_v2 = vld [vmem:[#allocation2 + $0x140] sm:$0xf]  ;;  %v1474_v3 = vld [vmem:[#allocation2 + $0x144] sm:$0xf0]  ;;  %v1441_v4 = vld [vmem:[#allocation2 + $0x44] sm:$0xf]  ;;  %v1148_v8 = vor.u32 %v1442_v1, %v1147_v0 }
  0x1e   :  { %736 = vmatpush.bf16.msra.mxu1 %v1508_v9  ;;  %1716 = vmatpush.bf16.msra.mxu3 %v1508_v9  ;;  %v1149_v5 = vld [vmem:[#allocation2 + $0x48] sm:$0xf0]  ;;  %v1473_v6 = vld [vmem:[#allocation2 + $0x144] sm:$0xf]  ;;  %v1276_v9 = vor.u32 %v1474_v3, %v1275_v2  ;;  %v1443_v16 = vld [vmem:[#allocation2 + $0x54] sm:$0xf] }
  0x1f   :  { %v1277_v7 = vld [vmem:[#allocation2 + $0x148] sm:$0xf0]  ;;  %v1157_v17 = vld [vmem:[#allocation2 + $0x58] sm:$0xf0]  ;;  %v1475_v18 = vld [vmem:[#allocation2 + $0x154] sm:$0xf] }
  0x20   :  { %v1285_v19 = vld [vmem:[#allocation2 + $0x158] sm:$0xf0]  ;;  %v1160_v22 = vor.u32 %v1443_v16, %v1157_v17  ;;  %v1445_v28 = vld [vmem:[#allocation2 + $0x64] sm:$0xf]  ;;  %v1165_v29 = vld [vmem:[#allocation2 + $0x68] sm:$0xf0] }
  0x21   :  { %568 = vmatpush.bf16.msra.mxu0 %v1499_v10  ;;  %1709 = vmatpush.bf16.msra.mxu2 %v1499_v10  ;;  %v1152_v10 = vor.u32 %v1441_v4, %v1149_v5  ;;  %v1288_v23 = vor.u32 %v1475_v18, %v1285_v19  ;;  %v1477_v30 = vld [vmem:[#allocation2 + $0x164] sm:$0xf]  ;;  %v1293_v31 = vld [vmem:[#allocation2 + $0x168] sm:$0xf0]  ;;  %v1168_v34 = vor.u32 %v1445_v28, %v1165_v29  ;;  %v1447_v40 = vld [vmem:[#allocation2 + $0x74] sm:$0xf] }
  0x22   :  { %737 = vmatpush.bf16.msra.mxu1 %v1507_v11  ;;  %1717 = vmatpush.bf16.msra.mxu3 %v1507_v11  ;;  %v1280_v11 = vor.u32 %v1473_v6, %v1277_v7  ;;  %v1296_v35 = vor.u32 %v1477_v30, %v1293_v31  ;;  %v1173_v41 = vld [vmem:[#allocation2 + $0x78] sm:$0xf0]  ;;  %v1479_v42 = vld [vmem:[#allocation2 + $0x174] sm:$0xf]  ;;  %v1449_v52 = vld [vmem:[#allocation2 + $0x84] sm:$0xf] }
  0x23   :  { %v1301_v43 = vld [vmem:[#allocation2 + $0x178] sm:$0xf0]  ;;  %v1176_v46 = vor.u32 %v1447_v40, %v1173_v41  ;;  %v1181_v53 = vld [vmem:[#allocation2 + $0x88] sm:$0xf0]  ;;  %v1481_v54 = vld [vmem:[#allocation2 + $0x184] sm:$0xf] }
  0x24   :  { %v1304_v47 = vor.u32 %v1479_v42, %v1301_v43  ;;  %v1309_v55 = vld [vmem:[#allocation2 + $0x188] sm:$0xf0]  ;;  %v1184_v59 = vor.u32 %v1449_v52, %v1181_v53  ;;  %v1483_v16 = vld [vmem:[#allocation2 + $0x194] sm:$0xf]  ;;  %v1317_v17 = vld [vmem:[#allocation2 + $0x198] sm:$0xf0] }
  0x25   :  { %569 = vmatpush.bf16.msra.mxu0 %v1498_v12  ;;  %1710 = vmatpush.bf16.msra.mxu2 %v1498_v12  ;;  %v1155_v12 = vld [vmem:[#allocation2 + $0x50] sm:$0xf]  ;;  %v1195_v42 = vld [vmem:[#allocation2 + $0xa0] sm:$0xf]  ;;  %v1454_v43 = vld [vmem:[#allocation2 + $0xa4] sm:$0xf0] }
  0x26   :  { %738 = vmatpush.bf16.msra.mxu1 %v1506_v13  ;;  %1718 = vmatpush.bf16.msra.mxu3 %v1506_v13  ;;  %v1444_v13 = vld [vmem:[#allocation2 + $0x54] sm:$0xf0]  ;;  %v1196_v53 = vor.u32 %v1454_v43, %v1195_v42 }
  0x27   :  { %v1156_v20 = vor.u32 %v1444_v13, %v1155_v12  ;;  %v1451_v12 = vld [vmem:[#allocation2 + $0x94] sm:$0xf]  ;;  %v1189_v13 = vld [vmem:[#allocation2 + $0x98] sm:$0xf0] }
  0x29   :  { %570 = vmatpush.bf16.msra.mxu0 %v1497_v14  ;;  %1711 = vmatpush.bf16.msra.mxu2 %v1497_v14  ;;  %v1283_v14 = vld [vmem:[#allocation2 + $0x150] sm:$0xf] }
  0x2a   :  { %739 = vmatpush.bf16.msra.mxu1 %v1505_v15  ;;  %1719 = vmatpush.bf16.msra.mxu3 %v1505_v15  ;;  %v1476_v15 = vld [vmem:[#allocation2 + $0x154] sm:$0xf0] }
  0x2b   :  { %v1284_v21 = vor.u32 %v1476_v15, %v1283_v14 }
  0x2c   :  { %571 = vmatmul.bf16.vlgmr.msra.gmra.mxu0 %v1116_v24  ;;  %651 = vmatmul.bf16.vlgmr.msra.gmra.mxu2 %v1244_v25  ;;  %v1163_v24 = vld [vmem:[#allocation2 + $0x60] sm:$0xf]  ;;  %v1446_v25 = vld [vmem:[#allocation2 + $0x64] sm:$0xf0] }
  0x2d   :  { %740 = vmatmul.bf16.vlgmr.msra.gmra.mxu1 %v1120_v26  ;;  %820 = vmatmul.bf16.vlgmr.msra.gmra.mxu3 %v1248_v27  ;;  %v1291_v26 = vld [vmem:[#allocation2 + $0x160] sm:$0xf]  ;;  %v1478_v27 = vld [vmem:[#allocation2 + $0x164] sm:$0xf0]  ;;  %v1164_v32 = vor.u32 %v1446_v25, %v1163_v24 }
  0x2e   :  { %v1292_v33 = vor.u32 %v1478_v27, %v1291_v26  ;;  %v1192_v26 = vor.u32 %v1451_v12, %v1189_v13  ;;  %v1320_v27 = vor.u32 %v1483_v16, %v1317_v17  ;;  %v1203_v13 = vld [vmem:[#allocation2 + $0xb0] sm:$0xf]  ;;  %v1488_v16 = vld [vmem:[#allocation2 + $0x1b4] sm:$0xf0]  ;;  %v1455_v17 = vld [vmem:[#allocation2 + $0xb4] sm:$0xf] }
  0x3c   :  { %576 = vmatmul.bf16.gmra.mxu0 %v1124_v36  ;;  %656 = vmatmul.bf16.gmra.mxu2 %v1252_v37  ;;  %v1171_v36 = vld [vmem:[#allocation2 + $0x70] sm:$0xf]  ;;  %v1448_v37 = vld [vmem:[#allocation2 + $0x74] sm:$0xf0] }
  0x3d   :  { %745 = vmatmul.bf16.gmra.mxu1 %v1128_v38  ;;  %825 = vmatmul.bf16.gmra.mxu3 %v1256_v39  ;;  %v1299_v38 = vld [vmem:[#allocation2 + $0x170] sm:$0xf]  ;;  %v1480_v39 = vld [vmem:[#allocation2 + $0x174] sm:$0xf0]  ;;  %v1172_v44 = vor.u32 %v1448_v37, %v1171_v36 }
  0x3e   :  { %v1300_v45 = vor.u32 %v1480_v39, %v1299_v38 }
  0x4c   :  { %581 = vmatmul.bf16.gmra.mxu0 %v1132_v48  ;;  %661 = vmatmul.bf16.gmra.mxu2 %v1260_v49  ;;  %v1179_v48 = vld [vmem:[#allocation2 + $0x80] sm:$0xf]  ;;  %v1450_v49 = vld [vmem:[#allocation2 + $0x84] sm:$0xf0] }
  0x4d   :  { %750 = vmatmul.bf16.gmra.mxu1 %v1136_v50  ;;  %830 = vmatmul.bf16.gmra.mxu3 %v1264_v51  ;;  %v1307_v50 = vld [vmem:[#allocation2 + $0x180] sm:$0xf]  ;;  %v1482_v51 = vld [vmem:[#allocation2 + $0x184] sm:$0xf0]  ;;  %v1180_v56 = vor.u32 %v1450_v49, %v1179_v48 }
  0x4e   :  { %v1308_v57 = vor.u32 %v1482_v51, %v1307_v50  ;;  %v1485_v50 = vld [vmem:[#allocation2 + $0x1a4] sm:$0xf]  ;;  %v1325_v51 = vld [vmem:[#allocation2 + $0x1a8] sm:$0xf0] }
  0x5c   :  { %586 = vmatmul.bf16.gmra.mxu0 %v1140_v60  ;;  %666 = vmatmul.bf16.gmra.mxu2 %v1268_v61  ;;  %v1312_v60 = vor.u32 %v1481_v54, %v1309_v55  ;;  %v1845_v61 = vld [vmem:[%s1919_s2] ss:$0 sm:$0xff]  ;;  %s1812_s2 = smov [#allocation7]  }
  0x5d   :  { %755 = vmatmul.bf16.gmra.mxu1 %v1144_v62  ;;  %835 = vmatmul.bf16.gmra.mxu3 %v1272_v63  ;;  %s1097_s26 = sshll.u32 %s1812_s2, 4  ;;  %s1098_s26 = int_to_ptr.vmem [resolvable:$true] %s1097_s26 }
  0x6c   :  { %591 = vmatmul.bf16.gmra.mxu0 %v1148_v8  ;;  %671 = vmatmul.bf16.gmra.mxu2 %v1276_v9  ;;  %v1187_v8 = vld [vmem:[#allocation2 + $0x90] sm:$0xf]  ;;  %v1452_v9 = vld [vmem:[#allocation2 + $0x94] sm:$0xf0] }
  0x6d   :  { %760 = vmatmul.bf16.gmra.mxu1 %v1152_v10  ;;  %840 = vmatmul.bf16.gmra.mxu3 %v1280_v11  ;;  %v1315_v10 = vld [vmem:[#allocation2 + $0x190] sm:$0xf]  ;;  %v1484_v11 = vld [vmem:[#allocation2 + $0x194] sm:$0xf0]  ;;  %v1188_v19 = vor.u32 %v1452_v9, %v1187_v8 }
  0x6e   :  { %v1316_v24 = vor.u32 %v1484_v11, %v1315_v10 }
  0x7c   :  { %596 = vmatmul.bf16.gmra.mxu0 %v1156_v20  ;;  %676 = vmatmul.bf16.gmra.mxu2 %v1284_v21 }
  0x7d   :  { %765 = vmatmul.bf16.gmra.mxu1 %v1160_v22  ;;  %845 = vmatmul.bf16.gmra.mxu3 %v1288_v23 }
  0x8c   :  { %601 = vmatmul.bf16.gmra.mxu0 %v1164_v32  ;;  %681 = vmatmul.bf16.gmra.mxu2 %v1292_v33 }
  0x8d   :  { %770 = vmatmul.bf16.gmra.mxu1 %v1168_v34  ;;  %850 = vmatmul.bf16.gmra.mxu3 %v1296_v35 }
  0x9c   :  { %606 = vmatmul.bf16.gmra.mxu0 %v1172_v44  ;;  %686 = vmatmul.bf16.gmra.mxu2 %v1300_v45  ;;  %v1323_v44 = vld [vmem:[#allocation2 + $0x1a0] sm:$0xf]  ;;  %v1486_v45 = vld [vmem:[#allocation2 + $0x1a4] sm:$0xf0] }
  0x9d   :  { %775 = vmatmul.bf16.gmra.mxu1 %v1176_v46  ;;  %855 = vmatmul.bf16.gmra.mxu3 %v1304_v47  ;;  %v1453_v46 = vld [vmem:[#allocation2 + $0xa4] sm:$0xf]  ;;  %v1197_v47 = vld [vmem:[#allocation2 + $0xa8] sm:$0xf0] }
  0xa9   :  { %v572_v58 = vpop.f32.mrf.mxu0 }
  0xaa   :  { %v741_v62 = vpop.f32.mrf.mxu1  ;;  %v573_v63 = vadd.f32 %v1845_v61, %v572_v58  ;;  %v1324_v58 = vor.u32 %v1486_v45, %v1323_v44 }
  0xac   :  { %611 = vmatmul.bf16.gmra.mxu0 %v1180_v56  ;;  %691 = vmatmul.bf16.gmra.mxu2 %v1308_v57  ;;  %v742_v3 = vadd.f32 %v741_v62, %v573_v63  ;;  %v1328_v62 = vor.u32 %v1485_v50, %v1325_v51  ;;  %v1490_v50 = vld [vmem:[#allocation2 + $0x1c4] sm:$0xf0]  ;;  %v1457_v51 = vld [vmem:[#allocation2 + $0xc4] sm:$0xf] }
  0xad   :  { %780 = vmatmul.bf16.gmra.mxu1 %v1184_v59  ;;  %860 = vmatmul.bf16.gmra.mxu3 %v1312_v60  ;;  %v1200_v60 = vor.u32 %v1453_v46, %v1197_v47  ;;  %v1211_v47 = vld [vmem:[#allocation2 + $0xc0] sm:$0xf] }
  0xae   :  { %v901_v14 = vmax.f32 %v742_v3, 0.0 }
  0xaf   :  { %v652_v0 = vpop.f32.mrf.mxu2 }
  0xb0   :  { %v821_v1 = vpop.f32.mrf.mxu3  ;;  %v653_v6 = vadd.f32 %v1845_v61, %v652_v0 }
  0xb1   :  { %v574_v2 = vpop.f32.mrf.mxu0 }
  0xb2   :  { %v575_v4 = vadd.f32 %v1845_v61, %v574_v2  ;;  %v743_v5 = vpop.f32.mrf.mxu1  ;;  %v822_v20 = vadd.f32 %v821_v1, %v653_v6 }
  0xb4   :  { %v744_v7 = vadd.f32 %v743_v5, %v575_v4  ;;  %v933_v30 = vmax.f32 %v822_v20, 0.0 }
  0xb6   :  { %v902_v15 = vmax.f32 %v744_v7, 0.0 }
  0xb7   :  { %v654_v18 = vpop.f32.mrf.mxu2 }
  0xb8   :  { %v1516_v21 = vpack.c.bf16 %v902_v15, %v901_v14  ;;  %v655_v22 = vadd.f32 %v1845_v61, %v654_v18  ;;  %v823_v23 = vpop.f32.mrf.mxu3  ;;  %v1456_v14 = vld [vmem:[#allocation2 + $0xb4] sm:$0xf0]  ;;  %v1331_v15 = vld [vmem:[#allocation2 + $0x1b0] sm:$0xf]  ;;  %v1205_v18 = vld [vmem:[#allocation2 + $0xb8] sm:$0xf0] }
  0xb9   :  { %v577_v25 = vpop.f32.mrf.mxu0 }
  0xba   :  { %1517 = vst [vmem:[#allocation7] sm:$0xff] %v1516_v21   ;;  %v824_v28 = vadd.f32 %v823_v23, %v655_v22  ;;  %v746_v29 = vpop.f32.mrf.mxu1  ;;  %v578_v33 = vadd.f32 %v1845_v61, %v577_v25  ;;  %v1487_v21 = vld [vmem:[#allocation2 + $0x1b4] sm:$0xf]  ;;  %v1333_v22 = vld [vmem:[#allocation2 + $0x1b8] sm:$0xf0] }
  0xbc   :  { %v934_v31 = vmax.f32 %v824_v28, 0.0  ;;  %616 = vmatmul.bf16.gmra.mxu0 %v1188_v19  ;;  %696 = vmatmul.bf16.gmra.mxu2 %v1316_v24  ;;  %v747_v37 = vadd.f32 %v746_v29, %v578_v33  ;;  %v1204_v24 = vor.u32 %v1456_v14, %v1203_v13  ;;  %v1332_v29 = vor.u32 %v1488_v16, %v1331_v15 }
  0xbd   :  { %785 = vmatmul.bf16.gmra.mxu1 %v1192_v26  ;;  %865 = vmatmul.bf16.gmra.mxu3 %v1320_v27 }
  0xbe   :  { %v1596_v32 = vpack.c.bf16 %v934_v31, %v933_v30  ;;  %v903_v48 = vmax.f32 %v747_v37, 0.0  ;;  %v1208_v31 = vor.u32 %v1455_v17, %v1205_v18  ;;  %v1219_v18 = vld [vmem:[#allocation2 + $0xd0] sm:$0xf] }
  0xbf   :  { %v657_v34 = vpop.f32.mrf.mxu2 }
  0xc0   :  { %1688 = vst [vmem:[#allocation7 + $0x80] sm:$0xff] %v1596_v32   ;;  %v826_v35 = vpop.f32.mrf.mxu3  ;;  %v658_v40 = vadd.f32 %v1845_v61, %v657_v34  ;;  %v1336_v32 = vor.u32 %v1487_v21, %v1333_v22  ;;  %v1492_v21 = vld [vmem:[#allocation2 + $0x1d4] sm:$0xf0]  ;;  %v1459_v22 = vld [vmem:[#allocation2 + $0xd4] sm:$0xf] }
  0xc1   :  { %v579_v36 = vpop.f32.mrf.mxu0 }
  0xc2   :  { %v580_v38 = vadd.f32 %v1845_v61, %v579_v36  ;;  %v748_v39 = vpop.f32.mrf.mxu1  ;;  %v827_v54 = vadd.f32 %v826_v35, %v658_v40 }
  0xc4   :  { %v749_v41 = vadd.f32 %v748_v39, %v580_v38  ;;  %v935_v1 = vmax.f32 %v827_v54, 0.0 }
  0xc6   :  { %v904_v49 = vmax.f32 %v749_v41, 0.0 }
  0xc7   :  { %v659_v52 = vpop.f32.mrf.mxu2 }
  0xc8   :  { %v1521_v55 = vpack.c.bf16 %v904_v49, %v903_v48  ;;  %v660_v56 = vadd.f32 %v1845_v61, %v659_v52  ;;  %v828_v57 = vpop.f32.mrf.mxu3  ;;  %v1458_v48 = vld [vmem:[#allocation2 + $0xc4] sm:$0xf0]  ;;  %v1339_v49 = vld [vmem:[#allocation2 + $0x1c0] sm:$0xf]  ;;  %v1213_v52 = vld [vmem:[#allocation2 + $0xc8] sm:$0xf0] }
  0xc9   :  { %v582_v59 = vpop.f32.mrf.mxu0 }
  0xca   :  { %1673 = vst [vmem:[#allocation7 + $0x8] sm:$0xff] %v1521_v55   ;;  %v829_v63 = vadd.f32 %v828_v57, %v660_v56  ;;  %v751_v0 = vpop.f32.mrf.mxu1  ;;  %v583_v4 = vadd.f32 %v1845_v61, %v582_v59  ;;  %v1489_v55 = vld [vmem:[#allocation2 + $0x1c4] sm:$0xf]  ;;  %v1341_v56 = vld [vmem:[#allocation2 + $0x1c8] sm:$0xf0] }
  0xcc   :  { %v936_v2 = vmax.f32 %v829_v63, 0.0  ;;  %621 = vmatmul.bf16.gmra.mxu0 %v1196_v53  ;;  %701 = vmatmul.bf16.gmra.mxu2 %v1324_v58  ;;  %v752_v8 = vadd.f32 %v751_v0, %v583_v4  ;;  %v1212_v58 = vor.u32 %v1458_v48, %v1211_v47  ;;  %v1340_v0 = vor.u32 %v1490_v50, %v1339_v49 }
  0xcd   :  { %790 = vmatmul.bf16.gmra.mxu1 %v1200_v60  ;;  %870 = vmatmul.bf16.gmra.mxu3 %v1328_v62 }
  0xce   :  { %v1601_v3 = vpack.c.bf16 %v936_v2, %v935_v1  ;;  %v905_v19 = vmax.f32 %v752_v8, 0.0  ;;  %v1216_v2 = vor.u32 %v1457_v51, %v1213_v52  ;;  %v1227_v52 = vld [vmem:[#allocation2 + $0xe0] sm:$0xf] }
  0xcf   :  { %v662_v5 = vpop.f32.mrf.mxu2 }
  0xd0   :  { %1689 = vst [vmem:[#allocation7 + $0x88] sm:$0xff] %v1601_v3   ;;  %v831_v6 = vpop.f32.mrf.mxu3  ;;  %v663_v11 = vadd.f32 %v1845_v61, %v662_v5  ;;  %v1344_v3 = vor.u32 %v1489_v55, %v1341_v56  ;;  %v1494_v55 = vld [vmem:[#allocation2 + $0x1e4] sm:$0xf0]  ;;  %v1461_v56 = vld [vmem:[#allocation2 + $0xe4] sm:$0xf] }
  0xd1   :  { %v584_v7 = vpop.f32.mrf.mxu0 }
  0xd2   :  { %v585_v9 = vadd.f32 %v1845_v61, %v584_v7  ;;  %v753_v10 = vpop.f32.mrf.mxu1  ;;  %v832_v25 = vadd.f32 %v831_v6, %v663_v11 }
  0xd4   :  { %v754_v12 = vadd.f32 %v753_v10, %v585_v9  ;;  %v937_v35 = vmax.f32 %v832_v25, 0.0 }
  0xd6   :  { %v906_v20 = vmax.f32 %v754_v12, 0.0 }
  0xd7   :  { %v664_v23 = vpop.f32.mrf.mxu2 }
  0xd8   :  { %v1526_v26 = vpack.c.bf16 %v906_v20, %v905_v19  ;;  %v665_v27 = vadd.f32 %v1845_v61, %v664_v23  ;;  %v833_v28 = vpop.f32.mrf.mxu3  ;;  %v1460_v19 = vld [vmem:[#allocation2 + $0xd4] sm:$0xf0]  ;;  %v1347_v20 = vld [vmem:[#allocation2 + $0x1d0] sm:$0xf]  ;;  %v1221_v23 = vld [vmem:[#allocation2 + $0xd8] sm:$0xf0] }
  0xd9   :  { %v587_v30 = vpop.f32.mrf.mxu0 }
  0xda   :  { %1674 = vst [vmem:[#allocation7 + $0x10] sm:$0xff] %v1526_v26   ;;  %v834_v33 = vadd.f32 %v833_v28, %v665_v27  ;;  %v756_v34 = vpop.f32.mrf.mxu1  ;;  %v588_v38 = vadd.f32 %v1845_v61, %v587_v30  ;;  %v1491_v26 = vld [vmem:[#allocation2 + $0x1d4] sm:$0xf]  ;;  %v1349_v27 = vld [vmem:[#allocation2 + $0x1d8] sm:$0xf0] }
  0xdc   :  { %v938_v36 = vmax.f32 %v834_v33, 0.0  ;;  %626 = vmatmul.bf16.gmra.mxu0 %v1204_v24  ;;  %706 = vmatmul.bf16.gmra.mxu2 %v1332_v29  ;;  %v757_v42 = vadd.f32 %v756_v34, %v588_v38  ;;  %v1220_v29 = vor.u32 %v1460_v19, %v1219_v18  ;;  %v1348_v34 = vor.u32 %v1492_v21, %v1347_v20 }
  0xdd   :  { %795 = vmatmul.bf16.gmra.mxu1 %v1208_v31  ;;  %875 = vmatmul.bf16.gmra.mxu3 %v1336_v32 }
  0xde   :  { %v1606_v37 = vpack.c.bf16 %v938_v36, %v937_v35  ;;  %v907_v53 = vmax.f32 %v757_v42, 0.0  ;;  %v1224_v36 = vor.u32 %v1459_v22, %v1221_v23  ;;  %v1235_v23 = vld [vmem:[#allocation2 + $0xf0] sm:$0xf] }
  0xdf   :  { %v667_v39 = vpop.f32.mrf.mxu2 }
  0xe0   :  { %1690 = vst [vmem:[#allocation7 + $0x90] sm:$0xff] %v1606_v37   ;;  %v836_v40 = vpop.f32.mrf.mxu3  ;;  %v668_v45 = vadd.f32 %v1845_v61, %v667_v39  ;;  %v1352_v37 = vor.u32 %v1491_v26, %v1349_v27  ;;  %v1496_v26 = vld [vmem:[#allocation2 + $0x1f4] sm:$0xf0]  ;;  %v1463_v27 = vld [vmem:[#allocation2 + $0xf4] sm:$0xf] }
  0xe1   :  { %v589_v41 = vpop.f32.mrf.mxu0 }
  0xe2   :  { %v590_v43 = vadd.f32 %v1845_v61, %v589_v41  ;;  %v758_v44 = vpop.f32.mrf.mxu1  ;;  %v837_v59 = vadd.f32 %v836_v40, %v668_v45 }
  0xe4   :  { %v759_v46 = vadd.f32 %v758_v44, %v590_v43  ;;  %v939_v6 = vmax.f32 %v837_v59, 0.0 }
  0xe6   :  { %v908_v54 = vmax.f32 %v759_v46, 0.0 }
  0xe7   :  { %v669_v57 = vpop.f32.mrf.mxu2 }
  0xe8   :  { %v1531_v60 = vpack.c.bf16 %v908_v54, %v907_v53  ;;  %v670_v62 = vadd.f32 %v1845_v61, %v669_v57  ;;  %v838_v63 = vpop.f32.mrf.mxu3  ;;  %v1462_v53 = vld [vmem:[#allocation2 + $0xe4] sm:$0xf0]  ;;  %v1355_v54 = vld [vmem:[#allocation2 + $0x1e0] sm:$0xf]  ;;  %v1229_v57 = vld [vmem:[#allocation2 + $0xe8] sm:$0xf0] }
  0xe9   :  { %v592_v1 = vpop.f32.mrf.mxu0 }
  0xea   :  { %1675 = vst [vmem:[#allocation7 + $0x18] sm:$0xff] %v1531_v60   ;;  %v839_v4 = vadd.f32 %v838_v63, %v670_v62  ;;  %v761_v5 = vpop.f32.mrf.mxu1  ;;  %v593_v9 = vadd.f32 %v1845_v61, %v592_v1  ;;  %v1493_v60 = vld [vmem:[#allocation2 + $0x1e4] sm:$0xf]  ;;  %v1357_v62 = vld [vmem:[#allocation2 + $0x1e8] sm:$0xf0] }
  0xec   :  { %v940_v7 = vmax.f32 %v839_v4, 0.0  ;;  %631 = vmatmul.bf16.gmra.mxu0 %v1212_v58  ;;  %711 = vmatmul.bf16.gmra.mxu2 %v1340_v0  ;;  %v762_v13 = vadd.f32 %v761_v5, %v593_v9  ;;  %v1228_v0 = vor.u32 %v1462_v53, %v1227_v52  ;;  %v1356_v5 = vor.u32 %v1494_v55, %v1355_v54 }
  0xed   :  { %800 = vmatmul.bf16.gmra.mxu1 %v1216_v2  ;;  %880 = vmatmul.bf16.gmra.mxu3 %v1344_v3 }
  0xee   :  { %v1611_v8 = vpack.c.bf16 %v940_v7, %v939_v6  ;;  %v909_v24 = vmax.f32 %v762_v13, 0.0  ;;  %v1232_v7 = vor.u32 %v1461_v56, %v1229_v57 }
  0xef   :  { %v672_v10 = vpop.f32.mrf.mxu2 }
  0xf0   :  { %1691 = vst [vmem:[#allocation7 + $0x98] sm:$0xff] %v1611_v8   ;;  %v841_v11 = vpop.f32.mrf.mxu3  ;;  %v673_v16 = vadd.f32 %v1845_v61, %v672_v10  ;;  %v1360_v8 = vor.u32 %v1493_v60, %v1357_v62 }
  0xf1   :  { %v594_v12 = vpop.f32.mrf.mxu0 }
  0xf2   :  { %v595_v14 = vadd.f32 %v1845_v61, %v594_v12  ;;  %v763_v15 = vpop.f32.mrf.mxu1  ;;  %v842_v30 = vadd.f32 %v841_v11, %v673_v16 }
  0xf4   :  { %v764_v17 = vadd.f32 %v763_v15, %v595_v14  ;;  %v941_v40 = vmax.f32 %v842_v30, 0.0 }
  0xf6   :  { %v910_v25 = vmax.f32 %v764_v17, 0.0 }
  0xf7   :  { %v674_v28 = vpop.f32.mrf.mxu2 }
  0xf8   :  { %v1536_v31 = vpack.c.bf16 %v910_v25, %v909_v24  ;;  %v675_v32 = vadd.f32 %v1845_v61, %v674_v28  ;;  %v843_v33 = vpop.f32.mrf.mxu3  ;;  %v1464_v24 = vld [vmem:[#allocation2 + $0xf4] sm:$0xf0]  ;;  %v1363_v25 = vld [vmem:[#allocation2 + $0x1f0] sm:$0xf]  ;;  %v1237_v28 = vld [vmem:[#allocation2 + $0xf8] sm:$0xf0] }
  0xf9   :  { %v597_v35 = vpop.f32.mrf.mxu0 }
  0xfa   :  { %1676 = vst [vmem:[#allocation7 + $0x20] sm:$0xff] %v1536_v31   ;;  %v844_v38 = vadd.f32 %v843_v33, %v675_v32  ;;  %v766_v39 = vpop.f32.mrf.mxu1  ;;  %v598_v43 = vadd.f32 %v1845_v61, %v597_v35  ;;  %v1495_v31 = vld [vmem:[#allocation2 + $0x1f4] sm:$0xf]  ;;  %v1365_v32 = vld [vmem:[#allocation2 + $0x1f8] sm:$0xf0] }
  0xfc   :  { %v942_v41 = vmax.f32 %v844_v38, 0.0  ;;  %636 = vmatmul.bf16.gmra.mxu0 %v1220_v29  ;;  %716 = vmatmul.bf16.gmra.mxu2 %v1348_v34  ;;  %v767_v47 = vadd.f32 %v766_v39, %v598_v43  ;;  %v1236_v34 = vor.u32 %v1464_v24, %v1235_v23  ;;  %v1364_v39 = vor.u32 %v1496_v26, %v1363_v25 }
  0xfd   :  { %805 = vmatmul.bf16.gmra.mxu1 %v1224_v36  ;;  %885 = vmatmul.bf16.gmra.mxu3 %v1352_v37 }
  0xfe   :  { %v1616_v42 = vpack.c.bf16 %v942_v41, %v941_v40  ;;  %v911_v58 = vmax.f32 %v767_v47, 0.0  ;;  %v1240_v41 = vor.u32 %v1463_v27, %v1237_v28 }
  0xff   :  { %v677_v44 = vpop.f32.mrf.mxu2 }
 0x100   :  { %1692 = vst [vmem:[#allocation7 + $0xa0] sm:$0xff] %v1616_v42   ;;  %v846_v45 = vpop.f32.mrf.mxu3  ;;  %v678_v50 = vadd.f32 %v1845_v61, %v677_v44  ;;  %v1368_v42 = vor.u32 %v1495_v31, %v1365_v32 }
 0x101   :  { %v599_v46 = vpop.f32.mrf.mxu0 }
 0x102   :  { %v600_v48 = vadd.f32 %v1845_v61, %v599_v46  ;;  %v768_v49 = vpop.f32.mrf.mxu1  ;;  %v847_v1 = vadd.f32 %v846_v45, %v678_v50 }
 0x104   :  { %v769_v51 = vadd.f32 %v768_v49, %v600_v48  ;;  %v943_v11 = vmax.f32 %v847_v1, 0.0 }
 0x106   :  { %v912_v59 = vmax.f32 %v769_v51, 0.0 }
 0x107   :  { %v679_v63 = vpop.f32.mrf.mxu2 }
 0x108   :  { %v1541_v2 = vpack.c.bf16 %v912_v59, %v911_v58  ;;  %v680_v3 = vadd.f32 %v1845_v61, %v679_v63  ;;  %v848_v4 = vpop.f32.mrf.mxu3 }
 0x109   :  { %v602_v6 = vpop.f32.mrf.mxu0 }
 0x10a   :  { %1677 = vst [vmem:[#allocation7 + $0x28] sm:$0xff] %v1541_v2   ;;  %v849_v9 = vadd.f32 %v848_v4, %v680_v3  ;;  %v771_v10 = vpop.f32.mrf.mxu1  ;;  %v603_v14 = vadd.f32 %v1845_v61, %v602_v6 }
 0x10c   :  { %v944_v12 = vmax.f32 %v849_v9, 0.0  ;;  %641 = vmatmul.bf16.gmra.mxu0 %v1228_v0  ;;  %721 = vmatmul.bf16.gmra.mxu2 %v1356_v5  ;;  %v772_v18 = vadd.f32 %v771_v10, %v603_v14 }
 0x10d   :  { %810 = vmatmul.bf16.gmra.mxu1 %v1232_v7  ;;  %890 = vmatmul.bf16.gmra.mxu3 %v1360_v8 }
 0x10e   :  { %v1621_v13 = vpack.c.bf16 %v944_v12, %v943_v11  ;;  %v913_v29 = vmax.f32 %v772_v18, 0.0 }
 0x10f   :  { %v682_v15 = vpop.f32.mrf.mxu2 }
 0x110   :  { %1693 = vst [vmem:[#allocation7 + $0xa8] sm:$0xff] %v1621_v13   ;;  %v851_v16 = vpop.f32.mrf.mxu3  ;;  %v683_v21 = vadd.f32 %v1845_v61, %v682_v15 }
 0x111   :  { %v604_v17 = vpop.f32.mrf.mxu0 }
 0x112   :  { %v605_v19 = vadd.f32 %v1845_v61, %v604_v17  ;;  %v773_v20 = vpop.f32.mrf.mxu1  ;;  %v852_v35 = vadd.f32 %v851_v16, %v683_v21 }
 0x114   :  { %v774_v22 = vadd.f32 %v773_v20, %v605_v19  ;;  %v945_v45 = vmax.f32 %v852_v35, 0.0 }
 0x116   :  { %v914_v30 = vmax.f32 %v774_v22, 0.0 }
 0x117   :  { %v684_v33 = vpop.f32.mrf.mxu2 }
 0x118   :  { %v1546_v36 = vpack.c.bf16 %v914_v30, %v913_v29  ;;  %v685_v37 = vadd.f32 %v1845_v61, %v684_v33  ;;  %v853_v38 = vpop.f32.mrf.mxu3 }
 0x119   :  { %v607_v40 = vpop.f32.mrf.mxu0 }
 0x11a   :  { %1678 = vst [vmem:[#allocation7 + $0x30] sm:$0xff] %v1546_v36   ;;  %v854_v43 = vadd.f32 %v853_v38, %v685_v37  ;;  %v776_v44 = vpop.f32.mrf.mxu1  ;;  %v608_v48 = vadd.f32 %v1845_v61, %v607_v40 }
 0x11c   :  { %v946_v46 = vmax.f32 %v854_v43, 0.0  ;;  %646 = vmatmul.bf16.gmra.mxu0 %v1236_v34  ;;  %726 = vmatmul.bf16.gmra.mxu2 %v1364_v39  ;;  %v777_v52 = vadd.f32 %v776_v44, %v608_v48 }
 0x11d   :  { %815 = vmatmul.bf16.gmra.mxu1 %v1240_v41  ;;  %895 = vmatmul.bf16.gmra.mxu3 %v1368_v42 }
 0x11e   :  { %v1626_v47 = vpack.c.bf16 %v946_v46, %v945_v45  ;;  %v915_v57 = vmax.f32 %v777_v52, 0.0 }
 0x11f   :  { %v687_v49 = vpop.f32.mrf.mxu2 }
 0x120   :  { %1694 = vst [vmem:[#allocation7 + $0xb0] sm:$0xff] %v1626_v47   ;;  %v856_v50 = vpop.f32.mrf.mxu3  ;;  %v688_v55 = vadd.f32 %v1845_v61, %v687_v49 }
 0x121   :  { %v609_v51 = vpop.f32.mrf.mxu0 }
 0x122   :  { %v610_v53 = vadd.f32 %v1845_v61, %v609_v51  ;;  %v778_v54 = vpop.f32.mrf.mxu1  ;;  %v857_v60 = vadd.f32 %v856_v50, %v688_v55 }
 0x124   :  { %v779_v56 = vadd.f32 %v778_v54, %v610_v53  ;;  %v947_v4 = vmax.f32 %v857_v60, 0.0 }
 0x126   :  { %v916_v58 = vmax.f32 %v779_v56, 0.0 }
 0x127   :  { %v689_v59 = vpop.f32.mrf.mxu2 }
 0x128   :  { %v1551_v62 = vpack.c.bf16 %v916_v58, %v915_v57  ;;  %v690_v63 = vadd.f32 %v1845_v61, %v689_v59  ;;  %v858_v0 = vpop.f32.mrf.mxu3 }
 0x129   :  { %v612_v1 = vpop.f32.mrf.mxu0 }
 0x12a   :  { %1679 = vst [vmem:[#allocation7 + $0x38] sm:$0xff] %v1551_v62   ;;  %v859_v2 = vadd.f32 %v858_v0, %v690_v63  ;;  %v781_v3 = vpop.f32.mrf.mxu1  ;;  %v613_v7 = vadd.f32 %v1845_v61, %v612_v1 }
 0x12c   :  { %v948_v5 = vmax.f32 %v859_v2, 0.0  ;;  %v782_v11 = vadd.f32 %v781_v3, %v613_v7 }
 0x12e   :  { %v1631_v6 = vpack.c.bf16 %v948_v5, %v947_v4  ;;  %v917_v16 = vmax.f32 %v782_v11, 0.0 }
 0x12f   :  { %v692_v8 = vpop.f32.mrf.mxu2 }
 0x130   :  { %1695 = vst [vmem:[#allocation7 + $0xb8] sm:$0xff] %v1631_v6   ;;  %v861_v9 = vpop.f32.mrf.mxu3  ;;  %v693_v14 = vadd.f32 %v1845_v61, %v692_v8 }
 0x131   :  { %v614_v10 = vpop.f32.mrf.mxu0 }
 0x132   :  { %v615_v12 = vadd.f32 %v1845_v61, %v614_v10  ;;  %v783_v13 = vpop.f32.mrf.mxu1  ;;  %v862_v19 = vadd.f32 %v861_v9, %v693_v14 }
 0x134   :  { %v784_v15 = vadd.f32 %v783_v13, %v615_v12  ;;  %v949_v26 = vmax.f32 %v862_v19, 0.0 }
 0x136   :  { %v918_v17 = vmax.f32 %v784_v15, 0.0 }
 0x137   :  { %v694_v18 = vpop.f32.mrf.mxu2 }
 0x138   :  { %v1556_v20 = vpack.c.bf16 %v918_v17, %v917_v16  ;;  %v695_v21 = vadd.f32 %v1845_v61, %v694_v18  ;;  %v863_v22 = vpop.f32.mrf.mxu3 }
 0x139   :  { %v617_v23 = vpop.f32.mrf.mxu0 }
 0x13a   :  { %1680 = vst [vmem:[#allocation7 + $0x40] sm:$0xff] %v1556_v20   ;;  %v864_v24 = vadd.f32 %v863_v22, %v695_v21  ;;  %v786_v25 = vpop.f32.mrf.mxu1  ;;  %v618_v29 = vadd.f32 %v1845_v61, %v617_v23 }
 0x13c   :  { %v950_v27 = vmax.f32 %v864_v24, 0.0  ;;  %v787_v33 = vadd.f32 %v786_v25, %v618_v29 }
 0x13e   :  { %v1636_v28 = vpack.c.bf16 %v950_v27, %v949_v26  ;;  %v919_v38 = vmax.f32 %v787_v33, 0.0 }
 0x13f   :  { %v697_v30 = vpop.f32.mrf.mxu2 }
 0x140   :  { %1696 = vst [vmem:[#allocation7 + $0xc0] sm:$0xff] %v1636_v28   ;;  %v866_v31 = vpop.f32.mrf.mxu3  ;;  %v698_v36 = vadd.f32 %v1845_v61, %v697_v30 }
 0x141   :  { %v619_v32 = vpop.f32.mrf.mxu0 }
 0x142   :  { %v620_v34 = vadd.f32 %v1845_v61, %v619_v32  ;;  %v788_v35 = vpop.f32.mrf.mxu1  ;;  %v867_v41 = vadd.f32 %v866_v31, %v698_v36 }
 0x144   :  { %v789_v37 = vadd.f32 %v788_v35, %v620_v34  ;;  %v951_v48 = vmax.f32 %v867_v41, 0.0 }
 0x146   :  { %v920_v39 = vmax.f32 %v789_v37, 0.0 }
 0x147   :  { %v699_v40 = vpop.f32.mrf.mxu2 }
 0x148   :  { %v1561_v42 = vpack.c.bf16 %v920_v39, %v919_v38  ;;  %v700_v43 = vadd.f32 %v1845_v61, %v699_v40  ;;  %v868_v44 = vpop.f32.mrf.mxu3 }
 0x149   :  { %v622_v45 = vpop.f32.mrf.mxu0 }
 0x14a   :  { %1681 = vst [vmem:[#allocation7 + $0x48] sm:$0xff] %v1561_v42   ;;  %v869_v46 = vadd.f32 %v868_v44, %v700_v43  ;;  %v791_v47 = vpop.f32.mrf.mxu1  ;;  %v623_v51 = vadd.f32 %v1845_v61, %v622_v45 }
 0x14c   :  { %v952_v49 = vmax.f32 %v869_v46, 0.0  ;;  %v792_v55 = vadd.f32 %v791_v47, %v623_v51 }
 0x14e   :  { %v1641_v50 = vpack.c.bf16 %v952_v49, %v951_v48  ;;  %v921_v60 = vmax.f32 %v792_v55, 0.0 }
 0x14f   :  { %v702_v52 = vpop.f32.mrf.mxu2 }
 0x150   :  { %1697 = vst [vmem:[#allocation7 + $0xc8] sm:$0xff] %v1641_v50   ;;  %v871_v53 = vpop.f32.mrf.mxu3  ;;  %v703_v58 = vadd.f32 %v1845_v61, %v702_v52 }
 0x151   :  { %v624_v54 = vpop.f32.mrf.mxu0 }
 0x152   :  { %v625_v56 = vadd.f32 %v1845_v61, %v624_v54  ;;  %v793_v57 = vpop.f32.mrf.mxu1  ;;  %v872_v0 = vadd.f32 %v871_v53, %v703_v58 }
 0x154   :  { %v794_v59 = vadd.f32 %v793_v57, %v625_v56  ;;  %v953_v7 = vmax.f32 %v872_v0, 0.0 }
 0x156   :  { %v922_v62 = vmax.f32 %v794_v59, 0.0 }
 0x157   :  { %v704_v63 = vpop.f32.mrf.mxu2 }
 0x158   :  { %v1566_v1 = vpack.c.bf16 %v922_v62, %v921_v60  ;;  %v705_v2 = vadd.f32 %v1845_v61, %v704_v63  ;;  %v873_v3 = vpop.f32.mrf.mxu3 }
 0x159   :  { %v627_v4 = vpop.f32.mrf.mxu0 }
 0x15a   :  { %1682 = vst [vmem:[#allocation7 + $0x50] sm:$0xff] %v1566_v1   ;;  %v874_v5 = vadd.f32 %v873_v3, %v705_v2  ;;  %v796_v6 = vpop.f32.mrf.mxu1  ;;  %v628_v10 = vadd.f32 %v1845_v61, %v627_v4 }
 0x15c   :  { %v954_v8 = vmax.f32 %v874_v5, 0.0  ;;  %v797_v14 = vadd.f32 %v796_v6, %v628_v10 }
 0x15e   :  { %v1646_v9 = vpack.c.bf16 %v954_v8, %v953_v7  ;;  %v923_v19 = vmax.f32 %v797_v14, 0.0 }
 0x15f   :  { %v707_v11 = vpop.f32.mrf.mxu2 }
 0x160   :  { %1698 = vst [vmem:[#allocation7 + $0xd0] sm:$0xff] %v1646_v9   ;;  %v876_v12 = vpop.f32.mrf.mxu3  ;;  %v708_v17 = vadd.f32 %v1845_v61, %v707_v11 }
 0x161   :  { %v629_v13 = vpop.f32.mrf.mxu0 }
 0x162   :  { %v630_v15 = vadd.f32 %v1845_v61, %v629_v13  ;;  %v798_v16 = vpop.f32.mrf.mxu1  ;;  %v877_v22 = vadd.f32 %v876_v12, %v708_v17 }
 0x164   :  { %v799_v18 = vadd.f32 %v798_v16, %v630_v15  ;;  %v955_v29 = vmax.f32 %v877_v22, 0.0 }
 0x166   :  { %v924_v20 = vmax.f32 %v799_v18, 0.0 }
 0x167   :  { %v709_v21 = vpop.f32.mrf.mxu2 }
 0x168   :  { %v1571_v23 = vpack.c.bf16 %v924_v20, %v923_v19  ;;  %v710_v24 = vadd.f32 %v1845_v61, %v709_v21  ;;  %v878_v25 = vpop.f32.mrf.mxu3 }
 0x169   :  { %v632_v26 = vpop.f32.mrf.mxu0 }
 0x16a   :  { %1683 = vst [vmem:[#allocation7 + $0x58] sm:$0xff] %v1571_v23   ;;  %v879_v27 = vadd.f32 %v878_v25, %v710_v24  ;;  %v801_v28 = vpop.f32.mrf.mxu1  ;;  %v633_v32 = vadd.f32 %v1845_v61, %v632_v26 }
 0x16c   :  { %v956_v30 = vmax.f32 %v879_v27, 0.0  ;;  %v802_v36 = vadd.f32 %v801_v28, %v633_v32 }
 0x16e   :  { %v1651_v31 = vpack.c.bf16 %v956_v30, %v955_v29  ;;  %v925_v41 = vmax.f32 %v802_v36, 0.0 }
 0x16f   :  { %v712_v33 = vpop.f32.mrf.mxu2 }
 0x170   :  { %1699 = vst [vmem:[#allocation7 + $0xd8] sm:$0xff] %v1651_v31   ;;  %v881_v34 = vpop.f32.mrf.mxu3  ;;  %v713_v39 = vadd.f32 %v1845_v61, %v712_v33 }
 0x171   :  { %v634_v35 = vpop.f32.mrf.mxu0 }
 0x172   :  { %v635_v37 = vadd.f32 %v1845_v61, %v634_v35  ;;  %v803_v38 = vpop.f32.mrf.mxu1  ;;  %v882_v44 = vadd.f32 %v881_v34, %v713_v39 }
 0x174   :  { %v804_v40 = vadd.f32 %v803_v38, %v635_v37  ;;  %v957_v51 = vmax.f32 %v882_v44, 0.0 }
 0x176   :  { %v926_v42 = vmax.f32 %v804_v40, 0.0 }
 0x177   :  { %v714_v43 = vpop.f32.mrf.mxu2 }
 0x178   :  { %v1576_v45 = vpack.c.bf16 %v926_v42, %v925_v41  ;;  %v715_v46 = vadd.f32 %v1845_v61, %v714_v43  ;;  %v883_v47 = vpop.f32.mrf.mxu3 }
 0x179   :  { %v637_v48 = vpop.f32.mrf.mxu0 }
 0x17a   :  { %1684 = vst [vmem:[#allocation7 + $0x60] sm:$0xff] %v1576_v45   ;;  %v884_v49 = vadd.f32 %v883_v47, %v715_v46  ;;  %v806_v50 = vpop.f32.mrf.mxu1  ;;  %v638_v54 = vadd.f32 %v1845_v61, %v637_v48 }
 0x17c   :  { %v958_v52 = vmax.f32 %v884_v49, 0.0  ;;  %v807_v58 = vadd.f32 %v806_v50, %v638_v54 }
 0x17e   :  { %v1656_v53 = vpack.c.bf16 %v958_v52, %v957_v51  ;;  %v927_v0 = vmax.f32 %v807_v58, 0.0 }
 0x17f   :  { %v717_v55 = vpop.f32.mrf.mxu2 }
 0x180   :  { %1700 = vst [vmem:[#allocation7 + $0xe0] sm:$0xff] %v1656_v53   ;;  %v886_v56 = vpop.f32.mrf.mxu3  ;;  %v718_v62 = vadd.f32 %v1845_v61, %v717_v55 }
 0x181   :  { %v639_v57 = vpop.f32.mrf.mxu0 }
 0x182   :  { %v640_v59 = vadd.f32 %v1845_v61, %v639_v57  ;;  %v808_v60 = vpop.f32.mrf.mxu1  ;;  %v887_v3 = vadd.f32 %v886_v56, %v718_v62 }
 0x184   :  { %v809_v63 = vadd.f32 %v808_v60, %v640_v59  ;;  %v959_v10 = vmax.f32 %v887_v3, 0.0 }
 0x186   :  { %v928_v1 = vmax.f32 %v809_v63, 0.0 }
 0x187   :  { %v719_v2 = vpop.f32.mrf.mxu2 }
 0x188   :  { %v1581_v4 = vpack.c.bf16 %v928_v1, %v927_v0  ;;  %v720_v5 = vadd.f32 %v1845_v61, %v719_v2  ;;  %v888_v6 = vpop.f32.mrf.mxu3 }
 0x189   :  { %v642_v7 = vpop.f32.mrf.mxu0 }
 0x18a   :  { %1685 = vst [vmem:[#allocation7 + $0x68] sm:$0xff] %v1581_v4   ;;  %v889_v8 = vadd.f32 %v888_v6, %v720_v5  ;;  %v811_v9 = vpop.f32.mrf.mxu1  ;;  %v643_v13 = vadd.f32 %v1845_v61, %v642_v7 }
 0x18c   :  { %v960_v11 = vmax.f32 %v889_v8, 0.0  ;;  %v812_v17 = vadd.f32 %v811_v9, %v643_v13 }
 0x18e   :  { %v1661_v12 = vpack.c.bf16 %v960_v11, %v959_v10  ;;  %v929_v22 = vmax.f32 %v812_v17, 0.0 }
 0x18f   :  { %v722_v14 = vpop.f32.mrf.mxu2 }
 0x190   :  { %1701 = vst [vmem:[#allocation7 + $0xe8] sm:$0xff] %v1661_v12   ;;  %v891_v15 = vpop.f32.mrf.mxu3  ;;  %v723_v20 = vadd.f32 %v1845_v61, %v722_v14 }
 0x191   :  { %v644_v16 = vpop.f32.mrf.mxu0 }
 0x192   :  { %v645_v18 = vadd.f32 %v1845_v61, %v644_v16  ;;  %v813_v19 = vpop.f32.mrf.mxu1  ;;  %v892_v25 = vadd.f32 %v891_v15, %v723_v20 }
 0x194   :  { %v814_v21 = vadd.f32 %v813_v19, %v645_v18  ;;  %v961_v32 = vmax.f32 %v892_v25, 0.0 }
 0x196   :  { %v930_v23 = vmax.f32 %v814_v21, 0.0 }
 0x197   :  { %v724_v24 = vpop.f32.mrf.mxu2 }
 0x198   :  { %v1586_v26 = vpack.c.bf16 %v930_v23, %v929_v22  ;;  %v725_v27 = vadd.f32 %v1845_v61, %v724_v24  ;;  %v893_v28 = vpop.f32.mrf.mxu3 }
 0x199   :  { %v647_v29 = vpop.f32.mrf.mxu0 }
 0x19a   :  { %1686 = vst [vmem:[#allocation7 + $0x70] sm:$0xff] %v1586_v26   ;;  %v894_v30 = vadd.f32 %v893_v28, %v725_v27  ;;  %v816_v31 = vpop.f32.mrf.mxu1  ;;  %v648_v35 = vadd.f32 %v1845_v61, %v647_v29 }
 0x19c   :  { %v962_v33 = vmax.f32 %v894_v30, 0.0  ;;  %v817_v39 = vadd.f32 %v816_v31, %v648_v35 }
 0x19e   :  { %v1666_v34 = vpack.c.bf16 %v962_v33, %v961_v32  ;;  %v931_v44 = vmax.f32 %v817_v39, 0.0 }
 0x19f   :  { %v727_v36 = vpop.f32.mrf.mxu2 }
 0x1a0   :  { %1702 = vst [vmem:[#allocation7 + $0xf0] sm:$0xff] %v1666_v34   ;;  %v896_v37 = vpop.f32.mrf.mxu3  ;;  %v728_v42 = vadd.f32 %v1845_v61, %v727_v36 }
 0x1a1   :  { %v649_v38 = vpop.f32.mrf.mxu0 }
 0x1a2   :  { %v650_v40 = vadd.f32 %v1845_v61, %v649_v38  ;;  %v818_v41 = vpop.f32.mrf.mxu1  ;;  %v897_v47 = vadd.f32 %v896_v37, %v728_v42 }
 0x1a4   :  { %v819_v43 = vadd.f32 %v818_v41, %v650_v40  ;;  %v963_v52 = vmax.f32 %v897_v47, 0.0 }
 0x1a6   :  { %v932_v45 = vmax.f32 %v819_v43, 0.0 }
 0x1a7   :  { %v729_v46 = vpop.f32.mrf.mxu2 }
 0x1a8   :  { %v1591_v48 = vpack.c.bf16 %v932_v45, %v931_v44  ;;  %v730_v49 = vadd.f32 %v1845_v61, %v729_v46  ;;  %v898_v50 = vpop.f32.mrf.mxu3 }
 0x1aa   :  { %1687 = vst [vmem:[#allocation7 + $0x78] sm:$0xff] %v1591_v48   ;;  %v899_v51 = vadd.f32 %v898_v50, %v730_v49 }
 0x1ac   :  { %v964_v53 = vmax.f32 %v899_v51, 0.0 }
 0x1ae   :  { %v1671_v54 = vpack.c.bf16 %v964_v53, %v963_v52 }
 0x1b0   :  { %1703 = vst [vmem:[#allocation7 + $0xf8] sm:$0xff] %v1671_v54  }
 0x1b1   :  { %1105 = dma.vmem_to_hbm [thread:$0]  %s1098_s26, 4096, %s1100_s29, [#allocation4], %s1810_s24, %s1810_s24, %s1811_s25  }
 0x1b2   :  { %1804 = dma.done.wait [#allocation4], 4096  }
 0x1b3   :  { %1805 = vsyncadd [#allocation4], 4294963200 }
 0x1b4   :  { %1110 = vsyncpa [#allocation3], 1 }
 0x1b5   :  { %1111 = vsyncpa [#allocation6], 1 }
 0x1b6   :  { %1112 = vsyncpa [#allocation4], 1 }

</bundles_post_ra>
